<compile_context>
chip_gen: v6e
topology: v6e:2x2x1
jax: 0.10.0
libtpu: 0.0.40
codegen_flags: <defaults>
</compile_context>

<pallas_src>
import jax
import jax.numpy as jnp
from jax import lax
from jax.experimental import pallas as pl
from jax.experimental.pallas import tpu as pltpu

S_PAD = 8      # padded state dim (contraction dim of fc1)
H_PAD = 128    # padded hidden dim (sublane dim of h)
OUT_PAD = 8    # padded head-output rows: row 0 = mu, row 1 = sigma


def _round_up(n, m):
    return ((n + m - 1) // m) * m


def _actor_kernel(ab_ref, xT_ref, w1T_ref, whT_ref, b1_ref, bh_ref, out_ref):
    a_bound = ab_ref[0]                                    # SMEM scalar

    # fc1 + relu: (H_PAD, S_PAD) @ (S_PAD, TB) -> (H_PAD, TB).
    # bf16 MXU inputs (deliberate), f32 accumulate; zero-padded rows/cols
    # contribute exactly 0.
    h = jnp.dot(w1T_ref[...], xT_ref[...],
                preferred_element_type=jnp.float32)
    h = jnp.maximum(h + b1_ref[...], 0.0)                  # f32 VPU math

    # fused mu/sigma heads: (OUT_PAD, H_PAD) @ (H_PAD, TB) -> (OUT_PAD, TB);
    # rows 0/1 carry the two heads, rows 2..7 are zero-weight filler.
    z = jnp.dot(whT_ref[...], h.astype(jnp.bfloat16),
                preferred_element_type=jnp.float32)
    z = z + bh_ref[...]                                    # (OUT_PAD, TB)

    # transcendentals only over the narrow (8, TB) slab
    mu = jnp.tanh(z) * a_bound                             # EUP tanh, VPU mul
    sg = jnp.logaddexp(0.0, z) + 0.1                       # stable softplus

    row = lax.broadcasted_iota(jnp.int32, z.shape, 0)
    out_ref[...] = jnp.where(row == 0, mu, sg)             # lane-dense store


def pack_params(params, s_dim, hidden=30):
    """Pad / fuse / transpose the natural (in, out) params into kernel operands."""
    w1, b1, wmu, bmu, wsg, bsg = params
    w1T = jnp.zeros((H_PAD, S_PAD), jnp.float32).at[:hidden, :s_dim].set(w1.T)
    whT = jnp.zeros((OUT_PAD, H_PAD), jnp.float32)
    whT = whT.at[0, :hidden].set(wmu[:, 0]).at[1, :hidden].set(wsg[:, 0])
    b1p = jnp.zeros((H_PAD, 1), jnp.float32).at[:hidden, 0].set(b1.reshape(-1))
    bhp = jnp.zeros((OUT_PAD, 1), jnp.float32)
    bhp = bhp.at[0, 0].set(bmu.reshape(())).at[1, 0].set(bsg.reshape(()))
    # bf16 for MXU operands only; biases stay f32 for the VPU path.
    return w1T.astype(jnp.bfloat16), whT.astype(jnp.bfloat16), b1p, bhp


def actor_net_forward(x, packed_params, a_bound, *, block_b=2048):
    """Returns (mu, sigma) of the Normal distribution, each (batch, 1) f32."""
    w1T, whT, b1p, bhp = packed_params
    B, s_dim = x.shape

    # Batch lives in the lane dim.  Target >=4 grid steps at large B so the
    # pipeline overlaps DMA/writeback and v7x megacore has work to shard,
    # while keeping tiles a multiple of 128 lanes (unmasked stores).
    b128 = _round_up(B, 128)
    tb = max(128, min(block_b, _round_up(b128 // 4, 128)))
    b_pad = _round_up(B, tb)

    xT = jnp.zeros((S_PAD, b_pad), jnp.float32).at[:s_dim, :B].set(x.T)
    xT = xT.astype(jnp.bfloat16)
    ab = jnp.asarray([a_bound], jnp.float32)

    out = pl.pallas_call(
        _actor_kernel,
        out_shape=jax.ShapeDtypeStruct((OUT_PAD, b_pad), jnp.float32),
        grid=(b_pad // tb,),
        in_specs=[
            pl.BlockSpec(memory_space=pltpu.MemorySpace.SMEM),   # a_bound scalar
            pl.BlockSpec((S_PAD, tb), lambda i: (0, i)),         # xT: batch-tiled
            pl.BlockSpec((H_PAD, S_PAD), lambda i: (0, 0)),      # W1ᵀ resident
            pl.BlockSpec((OUT_PAD, H_PAD), lambda i: (0, 0)),    # fused head Wᵀ
            pl.BlockSpec((H_PAD, 1), lambda i: (0, 0)),          # fc1 bias
            pl.BlockSpec((OUT_PAD, 1), lambda i: (0, 0)),        # head biases
        ],
        out_specs=pl.BlockSpec((OUT_PAD, tb), lambda i: (0, i)),
        compiler_params=pltpu.CompilerParams(
            dimension_semantics=("parallel",)),   # batch-parallel -> v7x megacore
    )(ab, xT, w1T, whT, b1p, bhp)

    mu = out[0, :B][:, None]        # padded batch columns are garbage; sliced off
    sigma = out[1, :B][:, None]
    return mu, sigma


def init_params(key, s_dim, hidden=30):
    """Deterministic init matching the PyTorch module's shapes.

    PyTorch Linear stores weight as (out, in); we keep (in, out).  Weights
    ~ N(0, 0.1) as in the module; biases get small random values here
    (deterministic stand-in for torch's uniform default) so bias packing is
    exercised by the correctness check.
    """
    k1, k2, k3, k4, k5, k6 = jax.random.split(key, 6)
    w1 = 0.1 * jax.random.normal(k1, (s_dim, hidden), jnp.float32)
    b1 = 0.1 * jax.random.normal(k4, (1, hidden), jnp.float32)
    wmu = 0.1 * jax.random.normal(k2, (hidden, 1), jnp.float32)
    bmu = 0.1 * jax.random.normal(k5, (1, 1), jnp.float32)
    wsg = 0.1 * jax.random.normal(k3, (hidden, 1), jnp.float32)
    bsg = 0.1 * jax.random.normal(k6, (1, 1), jnp.float32)
    return (w1, b1, wmu, bmu, wsg, bsg)


def reference_forward_bf16(x, params, a_bound):
    """Pure-JAX reference matching the kernel's bf16-MXU / f32-accum numerics."""
    w1, b1, wmu, bmu, wsg, bsg = params
    bf = jnp.bfloat16
    h = jnp.dot(x.astype(bf), w1.astype(bf), preferred_element_type=jnp.float32)
    h = jax.nn.relu(h + b1)
    hb = h.astype(bf)
    mu = jnp.tanh(jnp.dot(hb, wmu.astype(bf),
                          preferred_element_type=jnp.float32) + bmu) * a_bound
    sigma = jax.nn.softplus(jnp.dot(hb, wsg.astype(bf),
                                    preferred_element_type=jnp.float32) + bsg) + 0.1
    return mu, sigma


def reference_forward_f32(x, params, a_bound):
    """Full-f32 reference of the module's math (loose semantic sanity check)."""
    w1, b1, wmu, bmu, wsg, bsg = params
    h = jax.nn.relu(x @ w1 + b1)
    mu = jnp.tanh(h @ wmu + bmu) * a_bound
    sigma = jax.nn.softplus(h @ wsg + bsg) + 0.1
    return mu, sigma


if __name__ == "__main__":
    # Pendulum-v1: s_dim = 3, a_bound = 2.0
    s_dim = 3
    a_bound = 2.0
    batch = 8

    key = jax.random.PRNGKey(0)
    kx, kp = jax.random.split(key)
    x = jax.random.normal(kx, (batch, s_dim), jnp.float32)
    params = init_params(kp, s_dim)
    packed = pack_params(params, s_dim)

    mu, sigma = actor_net_forward(x, packed, a_bound)
    jax.block_until_ready((mu, sigma))

    mu_b, sg_b = reference_forward_bf16(x, params, a_bound)
    assert jnp.allclose(mu, mu_b, atol=1e-4), "mu mismatch vs bf16 reference"
    assert jnp.allclose(sigma, sg_b, atol=1e-4), "sigma mismatch vs bf16 reference"

    mu_f, sg_f = reference_forward_f32(x, params, a_bound)
    assert jnp.allclose(mu, mu_f, atol=2e-2), "mu far from f32 reference"
    assert jnp.allclose(sigma, sg_f, atol=2e-2), "sigma far from f32 reference"
    # TODO(synk): torch.distributions.Normal object has no Pallas equivalent;
    # the kernel returns its (loc, scale) parameters instead.

    print("KERNEL_OK")
</pallas_src>

<mosaic_0001>
module attributes {stable_mosaic.version = 11 : i64} {
  func.func @_actor_kernel(%arg0: i32, %arg1: memref<1xf32, #tpu.memory_space<smem>>, %arg2: memref<8x128xbf16, #tpu.memory_space<vmem>>, %arg3: memref<128x8xbf16, #tpu.memory_space<vmem>>, %arg4: memref<8x128xbf16, #tpu.memory_space<vmem>>, %arg5: memref<128x1xf32, #tpu.memory_space<vmem>>, %arg6: memref<8x1xf32, #tpu.memory_space<vmem>>, %arg7: memref<8x128xf32, #tpu.memory_space<vmem>>) attributes {dimension_semantics = [#tpu.dimension_semantics<parallel>], iteration_bounds = array<i64: 1>, scalar_prefetch = 0 : i64, scratch_operands = 0 : i64, tpu.core_type = #tpu.core_type<tc>, window_params = [{transform_indices = @transform_0, window_bounds = array<i64: 1>}, {transform_indices = @transform_1, window_bounds = array<i64: 8, 128>}, {pipeline_mode = #tpu.pipeline_mode<synchronous>, transform_indices = @transform_2, window_bounds = array<i64: 128, 8>}, {pipeline_mode = #tpu.pipeline_mode<synchronous>, transform_indices = @transform_3, window_bounds = array<i64: 8, 128>}, {pipeline_mode = #tpu.pipeline_mode<synchronous>, transform_indices = @transform_4, window_bounds = array<i64: 128, 1>}, {pipeline_mode = #tpu.pipeline_mode<synchronous>, transform_indices = @transform_5, window_bounds = array<i64: 8, 1>}, {transform_indices = @transform_6, window_bounds = array<i64: 8, 128>}]} {
    %c0 = arith.constant 0 : index
    %0 = memref.load %arg1[%c0] : memref<1xf32, #tpu.memory_space<smem>>
    %c0_0 = arith.constant 0 : index
    %c0_1 = arith.constant 0 : index
    %1 = vector.load %arg3[%c0_0, %c0_1] : memref<128x8xbf16, #tpu.memory_space<vmem>>, vector<128x8xbf16>
    %c0_2 = arith.constant 0 : index
    %c0_3 = arith.constant 0 : index
    %2 = vector.load %arg2[%c0_2, %c0_3] : memref<8x128xbf16, #tpu.memory_space<vmem>>, vector<8x128xbf16>
    %cst = arith.constant dense<0.000000e+00> : vector<128x128xf32>
    %3 = tpu.matmul %1, %2, %cst {dimension_numbers = #tpu.dot_dimension_numbers<[1], [0], [0], [1], [0, 0, 1, 1], [], []>} : vector<128x8xbf16>, vector<8x128xbf16>, vector<128x128xf32> -> vector<128x128xf32>
    %c0_4 = arith.constant 0 : index
    %c0_5 = arith.constant 0 : index
    %4 = vector.load %arg5[%c0_4, %c0_5] : memref<128x1xf32, #tpu.memory_space<vmem>>, vector<128x1xf32>
    %5 = vector.broadcast %4 : vector<128x1xf32> to vector<128x128xf32>
    %6 = arith.addf %3, %5 : vector<128x128xf32>
    %cst_6 = arith.constant 0.000000e+00 : f32
    %7 = vector.broadcast %cst_6 : f32 to vector<128x128xf32>
    %8 = arith.maximumf %6, %7 : vector<128x128xf32>
    %c0_7 = arith.constant 0 : index
    %c0_8 = arith.constant 0 : index
    %9 = vector.load %arg4[%c0_7, %c0_8] : memref<8x128xbf16, #tpu.memory_space<vmem>>, vector<8x128xbf16>
    %10 = arith.truncf %8 : vector<128x128xf32> to vector<128x128xbf16>
    %cst_9 = arith.constant dense<0.000000e+00> : vector<8x128xf32>
    %11 = tpu.matmul %9, %10, %cst_9 {dimension_numbers = #tpu.dot_dimension_numbers<[1], [0], [0], [1], [0, 0, 1, 1], [], []>} : vector<8x128xbf16>, vector<128x128xbf16>, vector<8x128xf32> -> vector<8x128xf32>
    %c0_10 = arith.constant 0 : index
    %c0_11 = arith.constant 0 : index
    %12 = vector.load %arg6[%c0_10, %c0_11] : memref<8x1xf32, #tpu.memory_space<vmem>>, vector<8x1xf32>
    %13 = vector.broadcast %12 : vector<8x1xf32> to vector<8x128xf32>
    %14 = arith.addf %11, %13 : vector<8x128xf32>
    %15 = math.tanh %14 : vector<8x128xf32>
    %16 = vector.broadcast %0 : f32 to vector<8x128xf32>
    %17 = arith.mulf %15, %16 : vector<8x128xf32>
    %cst_12 = arith.constant 0.000000e+00 : f32
    %18 = vector.broadcast %cst_12 : f32 to vector<8x128xf32>
    %19 = arith.maximumf %18, %14 : vector<8x128xf32>
    %20 = vector.broadcast %cst_12 : f32 to vector<8x128xf32>
    %21 = arith.subf %20, %14 : vector<8x128xf32>
    %22 = arith.cmpf one, %21, %21 : vector<8x128xf32>
    %23 = vector.broadcast %cst_12 : f32 to vector<8x128xf32>
    %24 = arith.addf %23, %14 : vector<8x128xf32>
    %25 = math.absf %21 : vector<8x128xf32>
    %cst_13 = arith.constant 0.000000e+00 : f32
    %26 = vector.broadcast %cst_13 : f32 to vector<8x128xf32>
    %27 = arith.subf %26, %25 : vector<8x128xf32>
    %28 = math.exp %27 : vector<8x128xf32>
    %29 = math.log1p %28 : vector<8x128xf32>
    %30 = arith.addf %19, %29 : vector<8x128xf32>
    %31 = arith.select %22, %24, %30 : vector<8x128xi1>, vector<8x128xf32>
    %cst_14 = arith.constant 1.000000e-01 : f32
    %32 = vector.broadcast %cst_14 : f32 to vector<8x128xf32>
    %33 = arith.addf %31, %32 : vector<8x128xf32>
    %34 = tpu.iota {dimensions = array<i32: 0>} : vector<8x128xi32>
    %c0_i32 = arith.constant 0 : i32
    %35 = vector.broadcast %c0_i32 : i32 to vector<8x128xi32>
    %36 = arith.cmpi eq, %34, %35 : vector<8x128xi32>
    %37 = arith.select %36, %17, %33 : vector<8x128xi1>, vector<8x128xf32>
    %c0_15 = arith.constant 0 : index
    %c0_16 = arith.constant 0 : index
    %38 = vector.load %arg7[%c0_15, %c0_16] : memref<8x128xf32, #tpu.memory_space<vmem>>, vector<8x128xf32>
    tpu.vector_store %arg7[%c0_15, %c0_16], %37 {strides = array<i32>} : memref<8x128xf32, #tpu.memory_space<vmem>>, vector<8x128xf32>,
    return
  }
  func.func @transform_0(%arg0: i32) -> i32 {
    %c0_i32 = arith.constant 0 : i32
    %c0_i32_0 = arith.constant 0 : i32
    return %c0_i32 : i32
  }
  func.func @transform_1(%arg0: i32) -> (i32, i32) {
    %c0_i32 = arith.constant 0 : i32
    %c0_i32_0 = arith.constant 0 : i32
    return %c0_i32, %arg0 : i32, i32
  }
  func.func @transform_2(%arg0: i32) -> (i32, i32) {
    %c0_i32 = arith.constant 0 : i32
    %c0_i32_0 = arith.constant 0 : i32
    %c0_i32_1 = arith.constant 0 : i32
    return %c0_i32, %c0_i32_0 : i32, i32
  }
  func.func @transform_3(%arg0: i32) -> (i32, i32) {
    %c0_i32 = arith.constant 0 : i32
    %c0_i32_0 = arith.constant 0 : i32
    %c0_i32_1 = arith.constant 0 : i32
    return %c0_i32, %c0_i32_0 : i32, i32
  }
  func.func @transform_4(%arg0: i32) -> (i32, i32) {
    %c0_i32 = arith.constant 0 : i32
    %c0_i32_0 = arith.constant 0 : i32
    %c0_i32_1 = arith.constant 0 : i32
    return %c0_i32, %c0_i32_0 : i32, i32
  }
  func.func @transform_5(%arg0: i32) -> (i32, i32) {
    %c0_i32 = arith.constant 0 : i32
    %c0_i32_0 = arith.constant 0 : i32
    %c0_i32_1 = arith.constant 0 : i32
    return %c0_i32, %c0_i32_0 : i32, i32
  }
  func.func @transform_6(%arg0: i32) -> (i32, i32) {
    %c0_i32 = arith.constant 0 : i32
    %c0_i32_0 = arith.constant 0 : i32
    return %c0_i32, %arg0 : i32, i32
  }
}

</mosaic_0001>

<bundles_post_ra>
// kernel: tpu_custom_call.1
= control target key start
LH: loop header
LB: loop body
LE: loop exit
PB: predicated region body
PF: predicated region fallthrough
CT: control target
= control target key end

     0   :  { %vm205_vm0 = vcmask 1043456   ;;  %vm180_vm1 = vcmask 64512   ;;  %v534_v5 = vmov 0   ;;  %s686_s0 = inlined_call_operand.<no memory space> [shape: f32[1], index: 0, kind: input, shape index: {}]   ;;  %s687_s1 = inlined_call_operand.vmem [shape: bf16[8,128], index: 1, kind: input, shape index: {}]   ;;  %s688_s2 = inlined_call_operand.vmem [shape: bf16[128,8], index: 2, kind: input, shape index: {}]   ;;  %s689_s3 = inlined_call_operand.vmem [shape: bf16[8,128], index: 3, kind: input, shape index: {}]   ;;  %s690_s4 = inlined_call_operand.vmem [shape: f32[128,1], index: 4, kind: input, shape index: {}]   ;;  %s691_s5 = inlined_call_operand.vmem [shape: f32[8,1], index: 5, kind: input, shape index: {}]   ;;  %s692_s6 = inlined_call_operand.hbm [shape: f32[8,128], index: 6, kind: output, shape index: {}]  }
   0x1   :  { %v43_v0 = vld [vmem:[%s687_s1] sm:$0xf]  ;;  %v499_v3 = vld [vmem:[%s688_s2 + $0x8] sm:$0xff]   ;;  %v500_v4 = vld [vmem:[%s688_s2 + $0x10] sm:$0xff]   ;;  %496 = vset.pattern.permute.xlu0 %v534_v5  ;;  %497 = vset.pattern.permute.xlu1 %v534_v5 }
   0x2   :  { %v498_v1 = vld [vmem:[%s688_s2] sm:$0xff]   ;;  %491 = vmatprep.subr.msk.bf16.mxu0 %vm205_vm0, %v43_v0  ;;  %v207_v2 = vsel %vm205_vm0, %v43_v0, 0  ;;  %v58_v6 = vld [vmem:[%s690_s4 + $0x70] sm:$0xff]  ;;  %v501_v7 = vld [vmem:[%s688_s2 + $0x18] sm:$0xff]  }
   0x3   :  { %454 = vmatpush3.bf16.msra.mxu0 %v207_v2  ;;  %455 = vmatprep.mubr.msk.bf16.mxu0 %vm180_vm1, %v498_v1  ;;  %v56_v8 = vld [vmem:[%s690_s4 + $0x60] sm:$0xff]  ;;  %v59_v10 = vld [vmem:[%s690_s4 + $0x78] sm:$0xff]  ;;  %v57_v11 = vld [vmem:[%s690_s4 + $0x68] sm:$0xff] }
   0x4   :  { %132 = vperm.xlu0 %496, %v58_v6   ;;  %v502_v9 = vld [vmem:[%s688_s2 + $0x20] sm:$0xff]   ;;  %122 = vperm.xlu1 %497, %v56_v8   ;;  %v54_v12 = vld [vmem:[%s690_s4 + $0x50] sm:$0xff] }
   0x6   :  { %456 = vmatmul.mubr.msk.bf16.vlgmr.msra.gmra.mxu0 %vm180_vm1, %v499_v3 }
   0x7   :  { %459 = vmatprep.mubr.msk.bf16.mxu0 %vm180_vm1, %v500_v4 }
   0x8   :  { %137 = vperm.xlu0 %496, %v59_v10   ;;  %127 = vperm.xlu1 %497, %v57_v11  }
   0xe   :  { %460 = vmatmul.mubr.msk.bf16.gmra.mxu0 %vm180_vm1, %v501_v7 }
   0xf   :  { %463 = vmatprep.mubr.msk.bf16.mxu0 %vm180_vm1, %v502_v9 }
  0x10   :  { %12 = vsyncpa [#allocation4], 0  ;;  %v55_v13 = vld [vmem:[%s690_s4 + $0x58] sm:$0xff]  ;;  %v503_v14 = vld [vmem:[%s688_s2 + $0x28] sm:$0xff]   ;;  %112 = vperm.xlu0 %496, %v54_v12   ;;  %v535_v28 = vmov 0.0   ;;  %vm536_vm2 = vmmov 0  }
  0x11   :  { %v504_v15 = vld [vmem:[%s688_s2 + $0x30] sm:$0xff]   ;;  %117 = vperm.xlu1 %497, %v55_v13   ;;  %v52_v16 = vld [vmem:[%s690_s4 + $0x40] sm:$0xff]  ;;  %v53_v17 = vld [vmem:[%s690_s4 + $0x48] sm:$0xff]  ;;  %471 = vmatprep.subr.bf16.mxu1 %v535_v28  ;;  %s537_s23 = smov [#allocation3]  }
  0x12   :  { %v50_v18 = vld [vmem:[%s690_s4 + $0x30] sm:$0xff]  ;;  %v51_v19 = vld [vmem:[%s690_s4 + $0x38] sm:$0xff]  ;;  %v48_v21 = vld [vmem:[%s690_s4 + $0x20] sm:$0xff]  ;;  %487 = vmatprep.mubr.msk.bf16.mxu1 %vm536_vm2, %v535_v28  ;;  %s411_s24 = sshll.u32 %s537_s23, 4  ;;  %s412_s24 = int_to_ptr.vmem [resolvable:$true] %s411_s24 }
  0x13   :  { %v505_v20 = vld [vmem:[%s688_s2 + $0x38] sm:$0xff]   ;;  %v49_v22 = vld [vmem:[%s690_s4 + $0x28] sm:$0xff]  ;;  %v46_v23 = vld [vmem:[%s690_s4 + $0x10] sm:$0xff]  ;;  %s512_s25 = scalar_lea.vmem %s412_s24, 128  ;;  %p517_p1 = scmp.lt.s32.totalorder %s412_s24, %s412_s24 }
  0x14   :  { %102 = vperm.xlu0 %496, %v52_v16   ;;  %v47_v24 = vld [vmem:[%s690_s4 + $0x18] sm:$0xff]  ;;  %v44_v25 = vld [vmem:[%s690_s4] sm:$0xff]  ;;  %v45_v26 = vld [vmem:[%s690_s4 + $0x8] sm:$0xff]  ;;  %p513_p0 = scmp.ne.s32.totalorder %s412_s24, %s512_s25  ;;  %p518_p2 = scmp.lt.s32.totalorder %s512_s25, %s512_s25 }
  0x15   :  { %107 = vperm.xlu1 %497, %v53_v17   ;;  %v331_v27 = vld [vmem:[%s691_s5] sm:$0xff] }
  0x16   :  { %464 = vmatmul.mubr.msk.bf16.gmra.mxu0 %vm180_vm1, %v503_v14  ;;  %p519_p3 = por %p518_p2, %p517_p1 }
  0x17   :  { %467 = vmatprep.mubr.msk.bf16.mxu0 %vm180_vm1, %v504_v15 }
  0x18   :  { %92 = vperm.xlu0 %496, %v50_v18   ;;  %p520_p4 = pnand %p519_p3, %p513_p0 }
  0x19   :  { %97 = vperm.xlu1 %497, %v51_v19  }
  0x1c   :  { %82 = vperm.xlu0 %496, %v48_v21  }
  0x1d   :  { %87 = vperm.xlu1 %497, %v49_v22  }
  0x1e   :  { %468 = vmatmul.mubr.msk.bf16.gmra.mxu0 %vm180_vm1, %v505_v20 }
  0x20   :  { %72 = vperm.xlu0 %496, %v46_v23  }
  0x21   :  { %77 = vperm.xlu1 %497, %v47_v24  }
  0x24   :  { %62 = vperm.xlu0 %496, %v44_v25  }
  0x25   :  { %67 = vperm.xlu1 %497, %v45_v26  }
  0x28   :  { %334 = vperm.xlu0 %496, %v331_v27  }
  0x7f   :  { %v123_v33 = vpop.permute.xlu1 %122  ;;  %v133_v35 = vpop.permute.xlu0 %132 }
  0x83   :  { %v128_v38 = vpop.permute.xlu1 %127  ;;  %v138_v40 = vpop.permute.xlu0 %137 }
  0x8b   :  { %v113_v45 = vpop.permute.xlu0 %112 }
  0x8c   :  { %v118_v43 = vpop.permute.xlu1 %117 }
  0x8f   :  { %v103_v51 = vpop.permute.xlu0 %102 }
  0x90   :  { %v108_v48 = vpop.permute.xlu1 %107 }
  0x93   :  { %v93_v63 = vpop.permute.xlu0 %92 }
  0x94   :  { %v98_v59 = vpop.permute.xlu1 %97 }
  0x97   :  { %v83_v8 = vpop.permute.xlu0 %82 }
  0x98   :  { %v88_v5 = vpop.permute.xlu1 %87 }
  0x9b   :  { %v73_v18 = vpop.permute.xlu0 %72 }
  0x9c   :  { %v78_v14 = vpop.permute.xlu1 %77 }
  0x9f   :  { %v63_v27 = vpop.permute.xlu0 %62 }
  0xa0   :  { %v68_v24 = vpop.permute.xlu1 %67 }
  0xc6   :  { %v661_v29 = vpop.f32.mrf.mxu0 }
  0xc7   :  { %v252_v25 = vadd.f32 %v661_v29, %v73_v18 }
  0xc8   :  { %v663_v30 = vpop.f32.mrf.mxu0 }
  0xca   :  { %v458_v31 = vpop.f32.mrf.mxu0 }
  0xcb   :  { %v255_v21 = vadd.f32 %v458_v31, %v78_v14 }
  0xcc   :  { %v665_v32 = vpop.f32.mrf.mxu0 }
  0xce   :  { %v461_v34 = vpop.f32.mrf.mxu0 }
  0xcf   :  { %v268_v12 = vadd.f32 %v461_v34, %v93_v63  ;;  %v247_v34 = vadd.f32 %v665_v32, %v68_v24  ;;  %v335_v32 = vpop.permute.xlu0 %334 }
  0xd0   :  { %v259_v36 = vpop.f32.mrf.mxu0 }
  0xd1   :  { %v312_v19 = vmax.f32 %v268_v12, 0.0  ;;  %v260_v20 = vadd.f32 %v259_v36, %v83_v8  ;;  %v244_v36 = vadd.f32 %v663_v30, %v63_v27 }
  0xd2   :  { %v462_v37 = vpop.f32.mrf.mxu0 }
  0xd3   :  { %v271_v9 = vadd.f32 %v462_v37, %v98_v59  ;;  %v310_v26 = vmax.f32 %v260_v20, 0.0  ;;  %v308_v37 = vmax.f32 %v252_v25, 0.0 }
  0xd4   :  { %v262_v39 = vpop.f32.mrf.mxu0 }
  0xd5   :  { %v313_v15 = vmax.f32 %v271_v9, 0.0  ;;  %v263_v16 = vadd.f32 %v262_v39, %v88_v5  ;;  %v306_v39 = vmax.f32 %v244_v36, 0.0 }
  0xd6   :  { %v465_v41 = vpop.f32.mrf.mxu0 }
  0xd7   :  { %v284_v0 = vadd.f32 %v465_v41, %v113_v45  ;;  %v326_v22 = vpack.c.bf16 %v313_v15, %v312_v19  ;;  %v311_v23 = vmax.f32 %v263_v16, 0.0 }
  0xd8   :  { %v275_v42 = vpop.f32.mrf.mxu0 }
  0xd9   :  { %v316_v6 = vmax.f32 %v284_v0, 0.0  ;;  %v276_v7 = vadd.f32 %v275_v42, %v103_v51 }
  0xda   :  { %v466_v44 = vpop.f32.mrf.mxu0 }
  0xdb   :  { %v287_v60 = vadd.f32 %v466_v44, %v118_v43  ;;  %v314_v13 = vmax.f32 %v276_v7, 0.0 }
  0xdc   :  { %v278_v46 = vpop.f32.mrf.mxu0 }
  0xdd   :  { %v317_v2 = vmax.f32 %v287_v60, 0.0  ;;  %v279_v3 = vadd.f32 %v278_v46, %v108_v48 }
  0xde   :  { %v469_v47 = vpop.f32.mrf.mxu0 }
  0xdf   :  { %v300_v50 = vadd.f32 %v469_v47, %v133_v35  ;;  %v328_v10 = vpack.c.bf16 %v317_v2, %v316_v6  ;;  %v315_v11 = vmax.f32 %v279_v3, 0.0  ;;  %v325_v35 = vpack.c.bf16 %v311_v23, %v310_v26 }
  0xe0   :  { %v291_v49 = vpop.f32.mrf.mxu0 }
  0xe1   :  { %v320_v55 = vmax.f32 %v300_v50, 0.0  ;;  %v292_v56 = vadd.f32 %v291_v49, %v123_v33  ;;  %v327_v17 = vpack.c.bf16 %v315_v11, %v314_v13  ;;  %v309_v33 = vmax.f32 %v255_v21, 0.0 }
  0xe2   :  { %v470_v52 = vpop.f32.mrf.mxu0 }
  0xe3   :  { %v303_v53 = vadd.f32 %v470_v52, %v138_v40  ;;  %v318_v1 = vmax.f32 %v292_v56, 0.0  ;;  %v324_v31 = vpack.c.bf16 %v309_v33, %v308_v37  ;;  %v322_v40 = vld [vmem:[%s689_s3] sm:$0xf] }
  0xe4   :  { %v294_v54 = vpop.f32.mrf.mxu0 }
  0xe5   :  { %v321_v57 = vmax.f32 %v303_v53, 0.0  ;;  %v295_v58 = vadd.f32 %v294_v54, %v128_v38  ;;  %v307_v38 = vmax.f32 %v247_v34, 0.0  ;;  %v400_v53 = vlaneseq }
  0xe7   :  { %v319_v61 = vmax.f32 %v295_v58, 0.0  ;;  %v330_v62 = vpack.c.bf16 %v321_v57, %v320_v55  ;;  %v323_v29 = vpack.c.bf16 %v307_v38, %v306_v39  ;;  %v401_v58 = vshrl.u32 %v400_v53, 7 }
  0xe9   :  { %472 = vmatpush3.bf16.msra.mxu1 %v330_v62  ;;  %v329_v4 = vpack.c.bf16 %v319_v61, %v318_v1  ;;  %v378_v62 = vstv %s686_s0  ;;  %vm402_vm5 = vcmp.eq.s32.totalorder %v401_v58, 0 }
  0xea   :  { %473 = vmatprep.subr.bf16.mxu1 %v535_v28 }
  0xed   :  { %474 = vmatpush3.bf16.msra.mxu1 %v329_v4 }
  0xee   :  { %475 = vmatprep.subr.bf16.mxu1 %v535_v28 }
  0xf1   :  { %476 = vmatpush3.bf16.msra.mxu1 %v328_v10 }
  0xf2   :  { %477 = vmatprep.subr.bf16.mxu1 %v535_v28 }
  0xf5   :  { %478 = vmatpush3.bf16.msra.mxu1 %v327_v17 }
  0xf6   :  { %479 = vmatprep.subr.bf16.mxu1 %v535_v28 }
  0xf9   :  { %480 = vmatpush3.bf16.msra.mxu1 %v326_v22 }
  0xfa   :  { %481 = vmatprep.subr.bf16.mxu1 %v535_v28 }
  0xfd   :  { %482 = vmatpush3.bf16.msra.mxu1 %v325_v35 }
  0xfe   :  { %483 = vmatprep.subr.bf16.mxu1 %v535_v28 }
 0x101   :  { %484 = vmatpush3.bf16.msra.mxu1 %v324_v31 }
 0x102   :  { %485 = vmatprep.subr.bf16.mxu1 %v535_v28 }
 0x105   :  { %486 = vmatpush3.bf16.msra.mxu1 %v323_v29 }
 0x108   :  { %488 = vmatmul.mubr.bf16.vlgmr.msra.gmra.mxu1 %v322_v40 }
 0x1c8   :  { %v371_v41 = vpop.f32.mrf.mxu1 }
 0x1c9   :  { %v372_v42 = vadd.f32 %v371_v41, %v335_v32 }
 0x1ca   :  { %v489_v30 = vpop.f32.mrf.mxu1 }
 0x1cb   :  { %v381_v43 = vsub.f32 0.0, %v372_v42  ;;  %v380_v57 = vmax.f32 %v372_v42, 0.0 }
 0x1cc   :  { %v374_v44 = vpop.f32.mrf.mxu1 }
 0x1cd   :  { %v384_v45 = vand.u32 2147483647, %v381_v43  ;;  %vm382_vm4 = vcmp.ne.f32.partialorder %v381_v43, %v381_v43 }
 0x1ce   :  { %v490_v46 = vpop.f32.mrf.mxu1 }
 0x1cf   :  { %v385_v47 = vsub.f32 0.0, %v384_v45 }
 0x1d1   :  { %v386_v48 = vmul.f32 1.442695, %v385_v47 }
 0x1d3   :  { %506 = vpow2.f32 %v386_v48 }
 0x1e0   :  { %v507_v49 = vpop.eup %506 }
 0x1e1   :  { %v388_v28 = vadd.f32 1.0, %v507_v49  ;;  %v391_v50 = vmul.f32 -0.5, %v507_v49  ;;  %v394_v52 = vand.u32 2147483647, %v507_v49 }
 0x1e3   :  { %508 = vlog2.f32 %v388_v28  ;;  %v392_v51 = vadd.f32 1.0, %v391_v50  ;;  %vm395_vm3 = vcmp.lt.f32.partialorder %v394_v52, 0.0004427343 }
 0x1e4   :  { %510 = vtanh.f32 %v372_v42 }
 0x1e5   :  { %v393_v56 = vmul.f32 %v507_v49, %v392_v51 }
 0x1f0   :  { %v509_v54 = vpop.eup %508 }
 0x1f1   :  { %v390_v55 = vmul.f32 0.6931472, %v509_v54  ;;  %v511_v60 = vpop.eup %510 }
 0x1f2   :  { %v379_v0 = vmul.f32 %v511_v60, %v378_v62 }
 0x1f3   :  { %v396_v59 = vsel %vm395_vm3, %v393_v56, %v390_v55 }
 0x1f4   :  { %v397_v61 = vadd.f32 %v396_v59, %v380_v57 }
 0x1f6   :  { %v398_v63 = vsel %vm382_vm4, %v372_v42, %v397_v61 }
 0x1f7   :  { %v399_v1 = vadd.f32 0.1, %v398_v63 }
 0x1f9   :  { %v403_v2 = vsel %vm402_vm5, %v379_v0, %v399_v1 }
 0x1fa   :  { %404 = vst [vmem:[#allocation3] sm:$0xff] %v403_v2 }
 0x1fb   :  { %523 = shalt.err (!%p520_p4)
}
 0x1fc   :  { %414 = dma.vmem_to_hbm [thread:$0]  %s412_s24, 128, %s692_s6, [#allocation4]  }
 0x1fd   :  { %532 = dma.done.wait [#allocation4], 128  }
 0x1fe   :  { %533 = vsyncadd [#allocation4], 4294967168 }
 0x1ff   :  { %418 = vsyncpa [#allocation4], 1 }

</bundles_post_ra>
